<compile_context>
chip_gen: v5e
topology: v5e:2x2
jax: 0.10.0
libtpu: 0.0.40
codegen_flags: <defaults>
</compile_context>

<pallas_src>
import functools

import jax
import jax.numpy as jnp
from jax.experimental import pallas as pl
from jax.experimental.pallas import tpu as pltpu

VMEM_LIMIT = 32 * 1024 * 1024  # well above our working sets on v5e/v6e/v7x


def _round_up(x, m):
    return (x + m - 1) // m * m


def _default_mm_tiles():
    # v5e MXU is 4x128x128 -> 128-aligned tm/tn; v6e/v7x are 2x256x256 -> 256.
    try:
        kind = jax.devices()[0].device_kind.lower()
    except Exception:
        kind = ""
    if "v5" in kind:
        return 128, 512, 128
    return 256, 512, 256


def _pick_row_block(rows, lanes, elem_bytes=2, budget=1 << 21):
    """Sublane-aligned row block keeping ~2 MiB per input buffer."""
    bm = (budget // max(1, lanes * elem_bytes)) // 16 * 16
    bm = max(16, min(64, bm))
    return min(bm, _round_up(rows, 16))


# --------------------------- Tiled MXU matmul --------------------------------

def _matmul_kernel(a_ref, b_ref, o_ref, acc_ref):
    @pl.when(pl.program_id(2) == 0)
    def _init():
        acc_ref[...] = jnp.zeros_like(acc_ref)

    acc_ref[...] += jnp.dot(a_ref[...], b_ref[...],
                            preferred_element_type=jnp.float32)

    @pl.when(pl.program_id(2) == pl.num_programs(2) - 1)
    def _finalize():
        o_ref[...] = acc_ref[...].astype(o_ref.dtype)


def pallas_matmul(a, b, out_dtype=jnp.bfloat16):
    """a:(M,K) @ b:(K,N) -> (M,N). bf16 operands, f32 accumulation, tiled."""
    M, K = a.shape
    K2, N = b.shape
    assert K == K2
    TM, TK, TN = _default_mm_tiles()
    tm = min(TM, _round_up(M, 16))
    tk = min(TK, _round_up(K, 128))
    tn = min(TN, _round_up(N, 128))
    Mp, Kp, Np = _round_up(M, tm), _round_up(K, tk), _round_up(N, tn)
    a_p = jnp.pad(a.astype(jnp.bfloat16), ((0, Mp - M), (0, Kp - K)))
    b_p = jnp.pad(b.astype(jnp.bfloat16), ((0, Kp - K), (0, Np - N)))
    out = pl.pallas_call(
        _matmul_kernel,
        out_shape=jax.ShapeDtypeStruct((Mp, Np), out_dtype),
        grid=(Mp // tm, Np // tn, Kp // tk),
        in_specs=[pl.BlockSpec((tm, tk), lambda i, j, k: (i, k)),
                  pl.BlockSpec((tk, tn), lambda i, j, k: (k, j))],
        out_specs=pl.BlockSpec((tm, tn), lambda i, j, k: (i, j)),
        scratch_shapes=[pltpu.VMEM((tm, tn), jnp.float32)],
        compiler_params=pltpu.CompilerParams(
            dimension_semantics=("parallel", "parallel", "arbitrary"),
            vmem_limit_bytes=VMEM_LIMIT),
    )(a_p, b_p)
    return out[:M, :N]


# --------------------------- Row-tiled elementwise kernels -------------------

def _inorm_kernel(x_ref, o_ref, *, relu, eps=1e-5):
    # rows = (n, c) instances, lanes = H*W. InstanceNorm2d(affine=False).
    x = x_ref[...].astype(jnp.float32)
    mean = jnp.mean(x, axis=-1, keepdims=True)
    var = jnp.mean(jnp.square(x - mean), axis=-1, keepdims=True)
    y = (x - mean) * jax.lax.rsqrt(var + eps)
    if relu:
        y = jnp.maximum(y, 0.0)
    o_ref[...] = y.astype(o_ref.dtype)


def _inorm_residual_kernel(x_ref, r_ref, o_ref, *, eps=1e-5):
    # residual + InstanceNorm(x)  (tail of ResidualBlock)
    x = x_ref[...].astype(jnp.float32)
    mean = jnp.mean(x, axis=-1, keepdims=True)
    var = jnp.mean(jnp.square(x - mean), axis=-1, keepdims=True)
    y = (x - mean) * jax.lax.rsqrt(var + eps)
    o_ref[...] = (r_ref[...].astype(jnp.float32) + y).astype(o_ref.dtype)


def instance_norm(x, relu=True, residual=None, out_dtype=jnp.bfloat16):
    N, C, H, W = x.shape
    rows, hw = N * C, H * W
    bm = _pick_row_block(rows, hw)
    rows_p = _round_up(rows, bm)
    x2 = jnp.pad(x.reshape(rows, hw), ((0, rows_p - rows), (0, 0)))
    spec = pl.BlockSpec((bm, hw), lambda i: (i, 0))
    cp = pltpu.CompilerParams(dimension_semantics=("parallel",),
                              vmem_limit_bytes=VMEM_LIMIT)
    if residual is None:
        out = pl.pallas_call(
            functools.partial(_inorm_kernel, relu=relu),
            out_shape=jax.ShapeDtypeStruct((rows_p, hw), out_dtype),
            grid=(rows_p // bm,), in_specs=[spec], out_specs=spec,
            compiler_params=cp,
        )(x2)
    else:
        r2 = jnp.pad(residual.reshape(rows, hw), ((0, rows_p - rows), (0, 0)))
        out = pl.pallas_call(
            _inorm_residual_kernel,
            out_shape=jax.ShapeDtypeStruct((rows_p, hw), out_dtype),
            grid=(rows_p // bm,), in_specs=[spec, spec], out_specs=spec,
            compiler_params=cp,
        )(x2, r2)
    return out[:rows].reshape(N, C, H, W)


def _tanh_kernel(x_ref, o_ref):
    o_ref[...] = jnp.tanh(x_ref[...].astype(jnp.float32))


def pallas_tanh(x):
    N, C, H, W = x.shape
    rows, hw = N * C, H * W
    bm = _pick_row_block(rows, hw)
    rows_p = _round_up(rows, bm)
    x2 = jnp.pad(x.reshape(rows, hw), ((0, rows_p - rows), (0, 0)))
    spec = pl.BlockSpec((bm, hw), lambda i: (i, 0))
    out = pl.pallas_call(
        _tanh_kernel,
        out_shape=jax.ShapeDtypeStruct((rows_p, hw), jnp.float32),
        grid=(rows_p // bm,), in_specs=[spec], out_specs=spec,
        compiler_params=pltpu.CompilerParams(
            dimension_semantics=("parallel",), vmem_limit_bytes=VMEM_LIMIT),
    )(x2)
    return out[:rows].reshape(N, C, H, W)


# --------------------------- Channel attention --------------------------------

def _pool_kernel(x_ref, avg_ref, max_ref):
    x = x_ref[...].astype(jnp.float32)
    avg_ref[...] = jnp.mean(x, axis=-1, keepdims=True)   # AdaptiveAvgPool2d(1)
    max_ref[...] = jnp.max(x, axis=-1, keepdims=True)    # AdaptiveMaxPool2d(1)


def _ca_fc_kernel(avg_ref, max_ref, w1t_ref, w2t_ref, s_ref):
    # fc2(relu(fc1(pool))) for both pools, summed, sigmoid. MXU dots.
    w1t = w1t_ref[...].astype(jnp.float32)
    w2t = w2t_ref[...].astype(jnp.float32)

    def mlp(v):
        h = jnp.maximum(jnp.dot(v, w1t, preferred_element_type=jnp.float32), 0.0)
        return jnp.dot(h, w2t, preferred_element_type=jnp.float32)

    a = mlp(avg_ref[...].astype(jnp.float32))
    m = mlp(max_ref[...].astype(jnp.float32))
    s_ref[...] = jax.nn.sigmoid(a + m)


def _gate_kernel(x_ref, s_ref, o_ref):
    o_ref[...] = (x_ref[...].astype(jnp.float32) *
                  s_ref[...].astype(jnp.float32)).astype(o_ref.dtype)


def channel_attention(x, w1, w2):
    """x: (N,C,H,W); w1, w2: (C, C) 1x1-conv weights (Cout, Cin), no bias."""
    N, C, H, W = x.shape
    rows, hw = N * C, H * W
    bm = _pick_row_block(rows, hw)
    rows_p = _round_up(rows, bm)
    x2 = jnp.pad(x.reshape(rows, hw), ((0, rows_p - rows), (0, 0)))
    row_spec = pl.BlockSpec((bm, hw), lambda i: (i, 0))
    col_spec = pl.BlockSpec((bm, 1), lambda i: (i, 0))
    cp = pltpu.CompilerParams(dimension_semantics=("parallel",),
                              vmem_limit_bytes=VMEM_LIMIT)

    # 1) tiled avg/max pooling reduce -> (rows, 1)
    avg, mx = pl.pallas_call(
        _pool_kernel,
        out_shape=(jax.ShapeDtypeStruct((rows_p, 1), jnp.float32),
                   jax.ShapeDtypeStruct((rows_p, 1), jnp.float32)),
        grid=(rows_p // bm,),
        in_specs=[row_spec], out_specs=(col_spec, col_spec),
        compiler_params=cp,
    )(x2)

    # 2) tiny fc+sigmoid pass producing the per-(n,c) gate s
    avg = avg[:rows].reshape(N, C)
    mx = mx[:rows].reshape(N, C)
    Npad = max(8, _round_up(N, 8))
    avg_p = jnp.pad(avg, ((0, Npad - N), (0, 0)))
    mx_p = jnp.pad(mx, ((0, Npad - N), (0, 0)))
    full = lambda i: (0, 0)
    s = pl.pallas_call(
        _ca_fc_kernel,
        out_shape=jax.ShapeDtypeStruct((Npad, C), jnp.float32),
        grid=(1,),
        in_specs=[pl.BlockSpec((Npad, C), full), pl.BlockSpec((Npad, C), full),
                  pl.BlockSpec((C, C), full), pl.BlockSpec((C, C), full)],
        out_specs=pl.BlockSpec((Npad, C), full),
        compiler_params=pltpu.CompilerParams(
            dimension_semantics=("arbitrary",), vmem_limit_bytes=VMEM_LIMIT),
    )(avg_p, mx_p, w1.T, w2.T)
    s_rows = jnp.pad(s[:N].reshape(rows, 1), ((0, rows_p - rows), (0, 0)))

    # 3) tiled elementwise gate x * s
    out = pl.pallas_call(
        _gate_kernel,
        out_shape=jax.ShapeDtypeStruct((rows_p, hw), x.dtype),
        grid=(rows_p // bm,),
        in_specs=[row_spec, col_spec], out_specs=row_spec,
        compiler_params=cp,
    )(x2, s_rows)
    return out[:rows].reshape(N, C, H, W)


# --------------------------- Conv glue (channel-major im2col) ----------------

def reflect_pad(x, p):
    return jnp.pad(x, ((0, 0), (0, 0), (p, p), (p, p)), mode="reflect")


def conv2d(x, w, stride=1, out_dtype=jnp.bfloat16):
    """x: (N,C,H,W), w: (Cout,Cin,kh,kw), no bias. Channel-major matmul so the
    big N*Ho*Wo axis is the lane dim (lane-dense even for Cout=3)."""
    N, C, H, W = x.shape
    Cout, Cin, kh, kw = w.shape
    Ho = (H - kh) // stride + 1
    Wo = (W - kw) // stride + 1
    xb = x.astype(jnp.bfloat16)
    cols = []
    for i in range(kh):
        for j in range(kw):
            cols.append(xb[:, :, i:i + stride * Ho:stride,
                              j:j + stride * Wo:stride])
    # (kh*kw, N, C, Ho, Wo) -> (C, kh*kw, N, Ho, Wo) -> (C*kh*kw, N*Ho*Wo)
    p = jnp.stack(cols, axis=0).transpose(2, 0, 1, 3, 4)
    p = p.reshape(C * kh * kw, N * Ho * Wo)
    wmat = w.reshape(Cout, Cin * kh * kw).astype(jnp.bfloat16)
    out_t = pallas_matmul(wmat, p, out_dtype=out_dtype)     # (Cout, N*Ho*Wo)
    return out_t.reshape(Cout, N, Ho, Wo).transpose(1, 0, 2, 3)


def conv_transpose2d(x, w):
    """ConvTranspose2d(k=3, stride=2, padding=1, output_padding=1), no bias.
    w: (Cin, Cout, 3, 3) PyTorch layout. Decomposed into the 4 output-parity
    sub-convolutions (no zero-insertion -> no 4x wasted MXU work)."""
    N, C, H, W = x.shape
    Cin, Cout, kh, kw = w.shape
    assert kh == 3 and kw == 3
    wt = w.transpose(1, 0, 2, 3)                             # (Cout, Cin, 3, 3)
    xp = jnp.pad(x, ((0, 0), (0, 0), (0, 1), (0, 1)))        # bottom/right zero

    # even row / even col: 1x1 conv with w[1,1]
    y_ee = conv2d(x, wt[:, :, 1:2, 1:2])
    # even row / odd col: taps x[p,q]*w[1,2] + x[p,q+1]*w[1,0]
    w_eo = jnp.stack([wt[:, :, 1, 2], wt[:, :, 1, 0]], axis=-1)[:, :, None, :]
    y_eo = conv2d(xp[:, :, :H, :], w_eo)
    # odd row / even col: taps x[p,q]*w[2,1] + x[p+1,q]*w[0,1]
    w_oe = jnp.stack([wt[:, :, 2, 1], wt[:, :, 0, 1]],
                     axis=-1).reshape(Cout, Cin, 2, 1)
    y_oe = conv2d(xp[:, :, :, :W], w_oe)
    # odd row / odd col: 2x2 kernel [[w22, w20], [w02, w00]]
    w_oo = jnp.stack([wt[:, :, 2, 2], wt[:, :, 2, 0],
                      wt[:, :, 0, 2], wt[:, :, 0, 0]],
                     axis=-1).reshape(Cout, Cin, 2, 2)
    y_oo = conv2d(xp, w_oo)

    # interleave the 4 parity planes -> (N, Cout, 2H, 2W)
    row_even = jnp.stack([y_ee, y_eo], axis=-1).reshape(N, Cout, H, 2 * W)
    row_odd = jnp.stack([y_oe, y_oo], axis=-1).reshape(N, Cout, H, 2 * W)
    return jnp.stack([row_even, row_odd], axis=3).reshape(N, Cout, 2 * H, 2 * W)


# --------------------------- Generator ---------------------------------------

def init_generator_params(key, input_nc, output_nc, compression_ratio=1.0,
                          n_residual_blocks=9):
    F0 = int(64 * compression_ratio)

    def conv_w(k, cout, cin, ksz):
        fan_in = cin * ksz * ksz
        return jax.random.normal(k, (cout, cin, ksz, ksz),
                                 jnp.float32) / jnp.sqrt(fan_in)

    keys = iter(jax.random.split(key, 8 + 2 * n_residual_blocks))
    params = {}
    params["conv_in"] = conv_w(next(keys), F0, input_nc, 7)
    params["down0"] = conv_w(next(keys), 2 * F0, F0, 3)
    params["down1"] = conv_w(next(keys), 4 * F0, 2 * F0, 3)
    for i in range(n_residual_blocks):
        params[f"res{i}_conv0"] = conv_w(next(keys), 4 * F0, 4 * F0, 3)
        params[f"res{i}_conv1"] = conv_w(next(keys), 4 * F0, 4 * F0, 3)
    # TODO(synk): the original module builds ChannelAttention(out_features=8*F0)
    # whose 1x1 convs are shape-incompatible with the 4*F0-channel tensor it
    # actually receives (PyTorch would raise); we size it 4*F0 so forward runs.
    Cca = 4 * F0
    params["ca_w1"] = conv_w(next(keys), Cca, Cca, 1)[:, :, 0, 0]
    params["ca_w2"] = conv_w(next(keys), Cca, Cca, 1)[:, :, 0, 0]
    # ConvTranspose2d weights use (C_in, C_out, kh, kw)
    params["up0"] = jax.random.normal(next(keys), (4 * F0, 2 * F0, 3, 3),
                                      jnp.float32) / jnp.sqrt(4 * F0 * 9)
    params["up1"] = jax.random.normal(next(keys), (2 * F0, F0, 3, 3),
                                      jnp.float32) / jnp.sqrt(2 * F0 * 9)
    params["conv_out"] = conv_w(next(keys), output_nc, F0, 7)
    return params


def generator_forward(x, params, n_residual_blocks):
    # initial: ReflectionPad(3) -> Conv7 -> InstanceNorm -> ReLU
    h = reflect_pad(x, 3)
    h = conv2d(h, params["conv_in"])
    h = instance_norm(h, relu=True)
    # 2x downsampling: Conv3 s2 p1 -> InstanceNorm -> ReLU
    for i in range(2):
        h = jnp.pad(h, ((0, 0), (0, 0), (1, 1), (1, 1)))
        h = conv2d(h, params[f"down{i}"], stride=2)
        h = instance_norm(h, relu=True)
    # residual blocks
    for i in range(n_residual_blocks):
        r = reflect_pad(h, 1)
        r = conv2d(r, params[f"res{i}_conv0"])
        r = instance_norm(r, relu=True)
        r = reflect_pad(r, 1)
        r = conv2d(r, params[f"res{i}_conv1"])
        h = instance_norm(r, relu=False, residual=h)   # x + conv_block(x)
    # channel attention gate
    h = channel_attention(h, params["ca_w1"], params["ca_w2"])
    # 2x upsampling: ConvTranspose3 s2 p1 op1 -> InstanceNorm -> ReLU
    for i in range(2):
        h = conv_transpose2d(h, params[f"up{i}"])
        h = instance_norm(h, relu=True)
    # output: ReflectionPad(3) -> Conv7 -> Tanh
    h = reflect_pad(h, 3)
    h = conv2d(h, params["conv_out"])
    return pallas_tanh(h)


if __name__ == "__main__":
    key = jax.random.PRNGKey(0)
    k_param, k_x = jax.random.split(key)

    input_nc, output_nc = 3, 3
    compression_ratio = 0.125     # first_conv_out = 8 -> small test
    n_residual_blocks = 2
    params = init_generator_params(k_param, input_nc, output_nc,
                                   compression_ratio, n_residual_blocks)

    x = jax.random.normal(k_x, (2, input_nc, 16, 16), jnp.float32)
    y = generator_forward(x, params, n_residual_blocks)
    y = jax.block_until_ready(y)
    assert y.shape == (2, output_nc, 16, 16), y.shape
    assert bool(jnp.all(jnp.isfinite(y)))
    print("KERNEL_OK")
</pallas_src>

<mosaic_0001>
module attributes {stable_mosaic.version = 11 : i64} {
  func.func @_matmul_kernel(%arg0: i32, %arg1: i32, %arg2: i32, %arg3: memref<16x256xbf16, #tpu.memory_space<vmem>>, %arg4: memref<256x256xbf16, #tpu.memory_space<vmem>>, %arg5: memref<16x256xbf16, #tpu.memory_space<vmem>>, %arg6: memref<16x256xf32, #tpu.memory_space<vmem>>) attributes {dimension_semantics = [#tpu.dimension_semantics<parallel>, #tpu.dimension_semantics<parallel>, #tpu.dimension_semantics<arbitrary>], iteration_bounds = array<i64: 1, 2, 1>, scalar_prefetch = 0 : i64, scratch_operands = 1 : i64, tpu.core_type = #tpu.core_type<tc>, window_params = [{transform_indices = @transform_0, window_bounds = array<i64: 16, 256>}, {transform_indices = @transform_1, window_bounds = array<i64: 256, 256>}, {transform_indices = @transform_2, window_bounds = array<i64: 16, 256>}]} {
    %c0_i32 = arith.constant 0 : i32
    %0 = arith.cmpi eq, %arg2, %c0_i32 : i32
    %1 = arith.extui %0 : i1 to i32
    %c0_i32_0 = arith.constant 0 : i32
    %2 = arith.cmpi ne, %1, %c0_i32_0 : i32
    scf.if %2 {
      %cst_10 = arith.constant 0.000000e+00 : f32
      %12 = vector.broadcast %cst_10 : f32 to vector<16x256xf32>
      %c0_11 = arith.constant 0 : index
      %c0_12 = arith.constant 0 : index
      %13 = vector.load %arg6[%c0_11, %c0_12] : memref<16x256xf32, #tpu.memory_space<vmem>>, vector<16x256xf32>
      tpu.vector_store %arg6[%c0_11, %c0_12], %12 {strides = array<i32>} : memref<16x256xf32, #tpu.memory_space<vmem>>, vector<16x256xf32>,
    } else {
    }
    %c0 = arith.constant 0 : index
    %c0_1 = arith.constant 0 : index
    %3 = vector.load %arg6[%c0, %c0_1] : memref<16x256xf32, #tpu.memory_space<vmem>>, vector<16x256xf32>
    %c0_2 = arith.constant 0 : index
    %c0_3 = arith.constant 0 : index
    %4 = vector.load %arg3[%c0_2, %c0_3] : memref<16x256xbf16, #tpu.memory_space<vmem>>, vector<16x256xbf16>
    %c0_4 = arith.constant 0 : index
    %c0_5 = arith.constant 0 : index
    %5 = vector.load %arg4[%c0_4, %c0_5] : memref<256x256xbf16, #tpu.memory_space<vmem>>, vector<256x256xbf16>
    %cst = arith.constant dense<0.000000e+00> : vector<16x256xf32>
    %6 = tpu.matmul %4, %5, %cst {dimension_numbers = #tpu.dot_dimension_numbers<[1], [0], [0], [1], [0, 0, 1, 1], [], []>} : vector<16x256xbf16>, vector<256x256xbf16>, vector<16x256xf32> -> vector<16x256xf32>
    %7 = arith.addf %3, %6 : vector<16x256xf32>
    %c0_6 = arith.constant 0 : index
    %c0_7 = arith.constant 0 : index
    %8 = vector.load %arg6[%c0_6, %c0_7] : memref<16x256xf32, #tpu.memory_space<vmem>>, vector<16x256xf32>
    tpu.vector_store %arg6[%c0_6, %c0_7], %7 {strides = array<i32>} : memref<16x256xf32, #tpu.memory_space<vmem>>, vector<16x256xf32>,
    %c0_i32_8 = arith.constant 0 : i32
    %9 = arith.cmpi eq, %arg2, %c0_i32_8 : i32
    %10 = arith.extui %9 : i1 to i32
    %c0_i32_9 = arith.constant 0 : i32
    %11 = arith.cmpi ne, %10, %c0_i32_9 : i32
    scf.if %11 {
      %c0_10 = arith.constant 0 : index
      %c0_11 = arith.constant 0 : index
      %12 = vector.load %arg6[%c0_10, %c0_11] : memref<16x256xf32, #tpu.memory_space<vmem>>, vector<16x256xf32>
      %13 = arith.truncf %12 : vector<16x256xf32> to vector<16x256xbf16>
      %c0_12 = arith.constant 0 : index
      %c0_13 = arith.constant 0 : index
      %14 = vector.load %arg5[%c0_12, %c0_13] : memref<16x256xbf16, #tpu.memory_space<vmem>>, vector<16x256xbf16>
      tpu.vector_store %arg5[%c0_12, %c0_13], %13 {strides = array<i32>} : memref<16x256xbf16, #tpu.memory_space<vmem>>, vector<16x256xbf16>,
    } else {
    }
    return
  }
  func.func @transform_0(%arg0: i32, %arg1: i32, %arg2: i32) -> (i32, i32) {
    %c0_i32 = arith.constant 0 : i32
    return %arg0, %arg2 : i32, i32
  }
  func.func @transform_1(%arg0: i32, %arg1: i32, %arg2: i32) -> (i32, i32) {
    %c0_i32 = arith.constant 0 : i32
    return %arg2, %arg1 : i32, i32
  }
  func.func @transform_2(%arg0: i32, %arg1: i32, %arg2: i32) -> (i32, i32) {
    %c0_i32 = arith.constant 0 : i32
    return %arg0, %arg1 : i32, i32
  }
}

</mosaic_0001>

<bundles_post_ra>
// kernel: tpu_custom_call.1
= control target key start
LH: loop header
LB: loop body
LE: loop exit
PB: predicated region body
PF: predicated region fallthrough
CT: control target
= control target key end

     0   :  { %7 = vsyncpa [#allocation4], 0  ;;  %s1302_s0 = inlined_call_operand.hbm [shape: bf16[16,256], index: 0, kind: input, shape index: {}]   ;;  %s1303_s1 = inlined_call_operand.hbm [shape: bf16[256,512], index: 1, kind: input, shape index: {}]   ;;  %s1304_s2 = inlined_call_operand.hbm [shape: bf16[16,512], index: 2, kind: output, shape index: {}]  }
   0x1   :  { %8 = vsyncpa [#allocation7], 0 }
   0x2   :  { %10 = vsyncpa [#allocation7 + $0x1], 0 }
   0x3   :  { %11 = vsyncpa [#allocation5], 0 }
   0x4   :  { %13 = vsyncpa [#allocation5 + $0x1], 0  ;;  %s1081_s9 = smov 0   ;;  %s1083_s10 = smov 0  }
   0x5   :  { %s1085_s11 = smov 0   ;;  %s1087_s12 = smov 0  }
   0x6   :  { %s1089_s13 = smov 0   ;;  %s1091_s14 = smov 0  }
   0x7 LB: > { %s643_s15 = sadd.s32 4294967295, %s1057_s14   ;;  %s644_s16 = sadd.s32 4294967294, %s1057_s14   ;;  %s1057_s14 = sphi %s1091_s14, %s19_s14   ;;  %s1053_s13 = sphi %s1089_s13, %s1318_s13   ;;  %s1049_s12 = sphi %s1087_s12, %s1317_s12   ;;  %s1045_s11 = sphi %s1085_s11, %s1316_s11   ;;  %s1041_s10 = sphi %s1083_s10, %s1315_s10   ;;  %s1037_s9 = sphi %s1081_s9, %s1314_s9  }
   0x8   : > { %p88_p0 = scmp.ne.s32.totalorder %s1041_s10, %s1037_s9  ;;  %p1115_p1 = scmp.eq.s32.totalorder %s643_s15, 0 }
   0x9   : > { %p1119_p2 = scmp.eq.s32.totalorder %s643_s15, 1  ;;  %p120_p3 = scmp.eq.s32.totalorder %s644_s16, 1 }
   0xa   : > { %p1125_p4 = por %p1115_p1, %p88_p0  ;;  %p645_p5 = scmp.ge.s32.totalorder %s1057_s14, 1 }
   0xb   : > { %p1130_p6 = por %p120_p3, %p88_p0  ;;  %p127_p7 = scmp.lt.s32.totalorder %s1057_s14, 3 }
   0xc   : > { %s144_s23 = sshll.u32 %s1302_s0, 4  ;;  %s1059_s25 = smov [#allocation3]   ;;  %s145_s23 = int_to_ptr.hbm [resolvable:$true] %s144_s23 }
   0xd   : > { %p1138_p8 = pnand %p645_p5, %p127_p7  ;;  %s146_s26 = sshll.u32 %s1059_s25, 4  ;;  %s147_s26 = int_to_ptr.vmem [resolvable:$true] %s146_s26 }
   0xe   : > { %p647_p11 = scmp.ge.s32.totalorder %s1057_s14, 2  ;;  %s1305_s27 = smov 128  }
   0xf   : > { %p840_p9 = pneg %p1138_p8  ;;  %s1061_s28 = smov 8  }
  0x10   : > { %s34_s29 = sadd.s32 1, %s1053_s13  ;;  %s75_s30 = sadd.s32 1, %s1045_s11 }
  0x11   : > { %p841_p10 = pnand %p840_p9, %p1115_p1  ;;  %p36_p12 = scmp.ge.s32.totalorder %s34_s29, 2 }
  0x12   : > { %p82_p13 = scmp.ne.s32.totalorder %s1045_s11, %s1041_s10  ;;  %p83_p0 = scmp.eq.s32.totalorder %s1057_s14, 0 }
  0x13   : > { %843 = dma.hbm_to_vmem [thread:$0]  (!%p841_p10), %s145_s23, 256, %s147_s26, [#allocation4], %s1305_s27, %s1305_s27, %s1061_s28  }
  0x14   : > { %s1320_s29 = smov (%p36_p12, %s34_s29), 0  ;;  %p1157_p3 = por %p83_p0, %p82_p13 }
  0x15   : > { %p1163_p5 = por %p1119_p2, %p82_p13  ;;  %s71_s5 = ssub.s32 %s1053_s13, %s1320_s29 }
  0x16   : > { %p853_p7 = scmp.lt.s32.totalorder %s1057_s14, 2  ;;  %p73_p9 = scmp.eq.s32.totalorder %s71_s5, 0 }
  0x17   : > { %s160_s6 = sand.u32 1, %s1045_s11   ;;  %s796_s15 = sshll.u32 %s1053_s13, 3 }
  0x18   : > { %s648_s7 = sshll.u32 %s160_s6, 8  ;;  %s172_s22 = scalar_lea.hbm %s1303_s1, %s796_s15 }
  0x19   : > { %s1172_s8 = scalar_select %p73_p9, %s1045_s11, %s75_s30  }
  0x1a   : > { %s164_s23 = scalar_lea.vmem [#allocation6], %s648_s7  ;;  %s173_s18 = sshll.u32 %s172_s22, 4  ;;  %s174_s18 = int_to_ptr.hbm [resolvable:$true] %s173_s18 }
  0x1b   : > { %s175_s25 = sshll.u32 %s164_s23, 4  ;;  %p845_p2 = pnand %p853_p7, %p1157_p3  ;;  %s176_s25 = int_to_ptr.vmem [resolvable:$true] %s175_s25 }
  0x1c   : > { %s161_s26 = scalar_lea.sflag [#allocation7], %s160_s6  ;;  %s1062_s27 = smov 256  }
  0x1d   : > { %s1313_s5 = smov 128   ;;  %187 = sbr.rel (%p1138_p8) target bundleno = 225 (0xe1), region = 28 }
  0x1e   : > { %847 = dma.hbm_to_vmem [thread:$0]  (!%p845_p2), %s174_s18, 4096, %s176_s25, %s161_s26, %s1062_s27, %s1313_s5, %s1061_s28  }
  0x22   : > { %1024 = dma.done.wait (%p1115_p1), [#allocation4], 256  }
  0x23   : > { %1026 = vsyncadd (%p1115_p1), [#allocation4], 4294967040  ;;  %s1189_s30 = sand.u32 1, %s1041_s10  }
  0x24   : > { %s653_s3 = sshll.u32 %s1189_s30, 8  ;;  %s195_s6 = scalar_lea.sflag [#allocation7], %s1189_s30 }
  0x25   : > { %s1193_s7 = scalar_lea.vmem [#allocation6], %s653_s3 }
  0x26   : > { %1028 = dma.done.wait (%p1125_p4), %s195_s6, 4096  }
  0x27   : > { %1030 = vsyncadd (%p1125_p4), %s195_s6, 4294963200  ;;  %v721_v0 = vld [vmem:[%s1193_s7 + $0x70] sm:$0xf]  ;;  %v814_v1 = vld [vmem:[%s1193_s7 + $0x74] sm:$0xf0]  ;;  %s654_s17 = sshll.u32 %s1189_s30, 4 }
  0x28   : > { %v785_v2 = vld [vmem:[%s1193_s7 + $0xf0] sm:$0xf]  ;;  %v722_v3 = vor.u32 %v814_v1, %v721_v0  ;;  %v830_v4 = vld [vmem:[%s1193_s7 + $0xf4] sm:$0xf0]  ;;  %v813_v5 = vld [vmem:[%s1193_s7 + $0x74] sm:$0xf] }
  0x29   : > { %v723_v6 = vld [vmem:[%s1193_s7 + $0x78] sm:$0xf0]  ;;  %v786_v7 = vor.u32 %v830_v4, %v785_v2  ;;  %v829_v9 = vld [vmem:[%s1193_s7 + $0xf4] sm:$0xf]  ;;  %v713_v11 = vld [vmem:[%s1193_s7 + $0x60] sm:$0xf] }
  0x2a   : > { %v726_v8 = vor.u32 %v813_v5, %v723_v6  ;;  %v787_v10 = vld [vmem:[%s1193_s7 + $0xf8] sm:$0xf0]  ;;  %442 = vmatpush.bf16.msra.mxu0 %v722_v3  ;;  %v812_v13 = vld [vmem:[%s1193_s7 + $0x64] sm:$0xf0]  ;;  %v777_v14 = vld [vmem:[%s1193_s7 + $0xe0] sm:$0xf] }
  0x2b   : > { %v790_v12 = vor.u32 %v829_v9, %v787_v10  ;;  %v828_v15 = vld [vmem:[%s1193_s7 + $0xe4] sm:$0xf0]  ;;  %456 = vmatpush.bf16.msra.mxu1 %v786_v7  ;;  %v714_v16 = vor.u32 %v812_v13, %v713_v11  ;;  %v811_v18 = vld [vmem:[%s1193_s7 + $0x64] sm:$0xf]  ;;  %v715_v19 = vld [vmem:[%s1193_s7 + $0x68] sm:$0xf0] }
  0x2c   : > { %470 = vmatpush.bf16.msra.mxu2 %v726_v8  ;;  %v778_v17 = vor.u32 %v828_v15, %v777_v14  ;;  %v827_v20 = vld [vmem:[%s1193_s7 + $0xe4] sm:$0xf]  ;;  %v718_v21 = vor.u32 %v811_v18, %v715_v19  ;;  %v779_v22 = vld [vmem:[%s1193_s7 + $0xe8] sm:$0xf0]  ;;  %v705_v23 = vld [vmem:[%s1193_s7 + $0x50] sm:$0xf] }
  0x2d   : > { %484 = vmatpush.bf16.msra.mxu3 %v790_v12  ;;  %v810_v24 = vld [vmem:[%s1193_s7 + $0x54] sm:$0xf0]  ;;  %v782_v25 = vor.u32 %v827_v20, %v779_v22  ;;  %v769_v26 = vld [vmem:[%s1193_s7 + $0xd0] sm:$0xf]  ;;  %v809_v28 = vld [vmem:[%s1193_s7 + $0x54] sm:$0xf] }
  0x2e   : > { %v826_v27 = vld [vmem:[%s1193_s7 + $0xd4] sm:$0xf0]  ;;  %443 = vmatpush.bf16.msra.mxu0 %v714_v16  ;;  %v706_v29 = vor.u32 %v810_v24, %v705_v23  ;;  %v707_v30 = vld [vmem:[%s1193_s7 + $0x58] sm:$0xf0]  ;;  %v825_v31 = vld [vmem:[%s1193_s7 + $0xd4] sm:$0xf] }
  0x2f   : > { %v771_v32 = vld [vmem:[%s1193_s7 + $0xd8] sm:$0xf0]  ;;  %457 = vmatpush.bf16.msra.mxu1 %v778_v17  ;;  %v770_v33 = vor.u32 %v826_v27, %v769_v26  ;;  %v710_v34 = vor.u32 %v809_v28, %v707_v30  ;;  %v697_v35 = vld [vmem:[%s1193_s7 + $0x40] sm:$0xf]  ;;  %v808_v36 = vld [vmem:[%s1193_s7 + $0x44] sm:$0xf0] }
  0x30   : > { %471 = vmatpush.bf16.msra.mxu2 %v718_v21  ;;  %v761_v37 = vld [vmem:[%s1193_s7 + $0xc0] sm:$0xf]  ;;  %v774_v38 = vor.u32 %v825_v31, %v771_v32  ;;  %v824_v39 = vld [vmem:[%s1193_s7 + $0xc4] sm:$0xf0]  ;;  %v807_v40 = vld [vmem:[%s1193_s7 + $0x44] sm:$0xf]  ;;  %v698_v44 = vor.u32 %v808_v36, %v697_v35 }
  0x31   : > { %485 = vmatpush.bf16.msra.mxu3 %v782_v25  ;;  %v699_v41 = vld [vmem:[%s1193_s7 + $0x48] sm:$0xf0]  ;;  %v823_v42 = vld [vmem:[%s1193_s7 + $0xc4] sm:$0xf]  ;;  %v762_v45 = vor.u32 %v824_v39, %v761_v37  ;;  %v689_v47 = vld [vmem:[%s1193_s7 + $0x30] sm:$0xf] }
  0x32   : > { %v763_v43 = vld [vmem:[%s1193_s7 + $0xc8] sm:$0xf0]  ;;  %444 = vmatpush.bf16.msra.mxu0 %v706_v29  ;;  %v702_v46 = vor.u32 %v807_v40, %v699_v41  ;;  %v806_v48 = vld [vmem:[%s1193_s7 + $0x34] sm:$0xf0]  ;;  %v753_v49 = vld [vmem:[%s1193_s7 + $0xb0] sm:$0xf] }
  0x33   : > { %458 = vmatpush.bf16.msra.mxu1 %v770_v33  ;;  %v766_v50 = vor.u32 %v823_v42, %v763_v43  ;;  %v822_v51 = vld [vmem:[%s1193_s7 + $0xb4] sm:$0xf0]  ;;  %v805_v52 = vld [vmem:[%s1193_s7 + $0x34] sm:$0xf]  ;;  %v691_v53 = vld [vmem:[%s1193_s7 + $0x38] sm:$0xf0]  ;;  %v690_v56 = vor.u32 %v806_v48, %v689_v47 }
  0x34   : > { %472 = vmatpush.bf16.msra.mxu2 %v710_v34  ;;  %v821_v54 = vld [vmem:[%s1193_s7 + $0xb4] sm:$0xf]  ;;  %v755_v55 = vld [vmem:[%s1193_s7 + $0xb8] sm:$0xf0]  ;;  %v754_v57 = vor.u32 %v822_v51, %v753_v49  ;;  %v694_v58 = vor.u32 %v805_v52, %v691_v53  ;;  %v681_v59 = vld [vmem:[%s1193_s7 + $0x20] sm:$0xf] }
  0x35   : > { %486 = vmatpush.bf16.msra.mxu3 %v774_v38  ;;  %v804_v60 = vld [vmem:[%s1193_s7 + $0x24] sm:$0xf0]  ;;  %v745_v61 = vld [vmem:[%s1193_s7 + $0xa0] sm:$0xf]  ;;  %v758_v62 = vor.u32 %v821_v54, %v755_v55  ;;  %v803_v0 = vld [vmem:[%s1193_s7 + $0x24] sm:$0xf] }
  0x36   : > { %445 = vmatpush.bf16.msra.mxu0 %v698_v44  ;;  %v820_v63 = vld [vmem:[%s1193_s7 + $0xa4] sm:$0xf0]  ;;  %v683_v1 = vld [vmem:[%s1193_s7 + $0x28] sm:$0xf0]  ;;  %v819_v2 = vld [vmem:[%s1193_s7 + $0xa4] sm:$0xf]  ;;  %v682_v4 = vor.u32 %v804_v60, %v681_v59 }
  0x37   : > { %459 = vmatpush.bf16.msra.mxu1 %v762_v45  ;;  %v747_v3 = vld [vmem:[%s1193_s7 + $0xa8] sm:$0xf0]  ;;  %v746_v5 = vor.u32 %v820_v63, %v745_v61  ;;  %v686_v6 = vor.u32 %v803_v0, %v683_v1  ;;  %v673_v7 = vld [vmem:[%s1193_s7 + $0x10] sm:$0xf]  ;;  %v802_v8 = vld [vmem:[%s1193_s7 + $0x14] sm:$0xf0] }
  0x38   : > { %473 = vmatpush.bf16.msra.mxu2 %v702_v46  ;;  %v737_v9 = vld [vmem:[%s1193_s7 + $0x90] sm:$0xf]  ;;  %v750_v10 = vor.u32 %v819_v2, %v747_v3  ;;  %v818_v11 = vld [vmem:[%s1193_s7 + $0x94] sm:$0xf0]  ;;  %v801_v12 = vld [vmem:[%s1193_s7 + $0x14] sm:$0xf]  ;;  %v674_v16 = vor.u32 %v802_v8, %v673_v7 }
  0x39   : > { %487 = vmatpush.bf16.msra.mxu3 %v766_v50  ;;  %v675_v13 = vld [vmem:[%s1193_s7 + $0x18] sm:$0xf0]  ;;  %v817_v14 = vld [vmem:[%s1193_s7 + $0x94] sm:$0xf]  ;;  %v738_v17 = vor.u32 %v818_v11, %v737_v9  ;;  %v665_v19 = vld [vmem:[%s1193_s7] sm:$0xf] }
  0x3a   : > { %446 = vmatpush.bf16.msra.mxu0 %v690_v56  ;;  %v739_v15 = vld [vmem:[%s1193_s7 + $0x98] sm:$0xf0]  ;;  %v678_v18 = vor.u32 %v801_v12, %v675_v13  ;;  %v800_v20 = vld [vmem:[%s1193_s7 + $0x4] sm:$0xf0]  ;;  %v729_v21 = vld [vmem:[%s1193_s7 + $0x80] sm:$0xf] }
  0x3b   : > { %460 = vmatpush.bf16.msra.mxu1 %v754_v57  ;;  %v742_v22 = vor.u32 %v817_v14, %v739_v15  ;;  %v816_v23 = vld [vmem:[%s1193_s7 + $0x84] sm:$0xf0]  ;;  %v799_v24 = vld [vmem:[%s1193_s7 + $0x4] sm:$0xf]  ;;  %v667_v25 = vld [vmem:[%s1193_s7 + $0x8] sm:$0xf0]  ;;  %v666_v28 = vor.u32 %v800_v20, %v665_v19 }
  0x3c   : > { %474 = vmatpush.bf16.msra.mxu2 %v694_v58  ;;  %v815_v26 = vld [vmem:[%s1193_s7 + $0x84] sm:$0xf]  ;;  %v731_v27 = vld [vmem:[%s1193_s7 + $0x88] sm:$0xf0]  ;;  %v657_v29 = vld [vmem:[#allocation3] sm:$0xf]  ;;  %v730_v31 = vor.u32 %v816_v23, %v729_v21  ;;  %v670_v32 = vor.u32 %v799_v24, %v667_v25 }
  0x3d   : > { %488 = vmatpush.bf16.msra.mxu3 %v758_v62  ;;  %v798_v30 = vld [vmem:[#allocation3 + $0x4] sm:$0xf0]  ;;  %v797_v33 = vld [vmem:[#allocation3 + $0x4] sm:$0xf]  ;;  %v659_v34 = vld [vmem:[#allocation3 + $0x8] sm:$0xf0]  ;;  %v734_v35 = vor.u32 %v815_v26, %v731_v27 }
  0x3e   : > { %447 = vmatpush.bf16.msra.mxu0 %v682_v4  ;;  %v658_v36 = vor.u32 %v798_v30, %v657_v29  ;;  %v662_v37 = vor.u32 %v797_v33, %v659_v34  ;;  %s831_s19 = sshll.u32 %s1049_s12, 3  ;;  %s219_s15 = scalar_lea.vmem [#allocation8], %s654_s17 }
  0x3f   : > { %461 = vmatpush.bf16.msra.mxu1 %v746_v5  ;;  %s532_s28 = scalar_lea.hbm %s1304_s2, %s831_s19  ;;  %s533_s16 = sshll.u32 %s219_s15, 4  ;;  %s534_s16 = int_to_ptr.vmem [resolvable:$true] %s533_s16 }
  0x40   : > { %475 = vmatpush.bf16.msra.mxu2 %v686_v6  ;;  %s535_s21 = sshll.u32 %s532_s28, 4  ;;  %s518_s12 = scalar_lea.sflag [#allocation5], %s1189_s30  ;;  %s536_s21 = int_to_ptr.hbm [resolvable:$true] %s535_s21 }
  0x41   : > { %489 = vmatpush.bf16.msra.mxu3 %v750_v10  ;;  %s985_s22 = sshra.s32 %s536_s21, 4  ;;  %s991_s26 = scalar_lea.hbm %s1304_s2, 32  ;;  %s986_s22 = int_to_ptr.hbm [resolvable:$true] %s985_s22 }
  0x42   : > { %448 = vmatpush.bf16.msra.mxu0 %v674_v16  ;;  %s987_s23 = scalar_lea.hbm %s986_s22, 16  ;;  %p992_p10 = scmp.lt.s32.totalorder %s986_s22, %s1304_s2 }
  0x43   : > { %462 = vmatpush.bf16.msra.mxu1 %v738_v17  ;;  %p988_p1 = scmp.ne.s32.totalorder %s986_s22, %s987_s23  ;;  %p993_p12 = scmp.lt.s32.totalorder %s991_s26, %s987_s23 }
  0x44   : > { %476 = vmatpush.bf16.msra.mxu2 %v678_v18 }
  0x45   : > { %490 = vmatpush.bf16.msra.mxu3 %v742_v22  ;;  %p989_p4 = pnand %p988_p1, %p1163_p5  ;;  %p994_p13 = por %p993_p12, %p992_p10 }
  0x46   : > { %449 = vmatpush.bf16.msra.mxu0 %v666_v28 }
  0x47   : > { %463 = vmatpush.bf16.msra.mxu1 %v730_v31  ;;  %p990_p8 = pneg %p989_p4 }
  0x48   : > { %477 = vmatpush.bf16.msra.mxu2 %v670_v32 }
  0x49   : > { %491 = vmatpush.bf16.msra.mxu3 %v734_v35  ;;  %450 = vmatmul.bf16.vlgmr.msra.gmra.mxu0 %v658_v36  ;;  %p995_p0 = pnand %p994_p13, %p990_p8 }
  0x4a   : > { %464 = vmatmul.bf16.vlgmr.msra.gmra.mxu1 %v662_v37 }
  0x4b   : > { %478 = vmatmul.bf16.vlgmr.msra.gmra.mxu2 %v658_v36 }
  0x4c   : > { %492 = vmatmul.bf16.vlgmr.msra.gmra.mxu3 %v662_v37 }
  0xc6   : > { %v451_v38 = vpop.f32.mrf.mxu0 }
  0xc7   : > { %v465_v39 = vpop.f32.mrf.mxu1 }
  0xc8   : > { %v466_v40 = vadd.f32 %v465_v39, %v451_v38 }
  0xce   : > { %v479_v41 = vpop.f32.mrf.mxu2  ;;  %v453_v45 = vpop.f32.mrf.mxu0 }
  0xcf   : > { %v493_v42 = vpop.f32.mrf.mxu3  ;;  %v467_v46 = vpop.f32.mrf.mxu1 }
  0xd0   : > { %v494_v43 = vadd.f32 %v493_v42, %v479_v41  ;;  %v468_v49 = vadd.f32 %v467_v46, %v453_v45 }
  0xd2   : > { %v513_v44 = vpack.c.bf16 %v494_v43, %v466_v40 }
  0xd4   : > { %515 = vst [vmem:[%s219_s15] sm:$0xff] %v513_v44 }
  0xd6   : > { %v481_v47 = vpop.f32.mrf.mxu2 }
  0xd7   : > { %v495_v48 = vpop.f32.mrf.mxu3 }
  0xd8   : > { %v496_v50 = vadd.f32 %v495_v48, %v481_v47 }
  0xda   : > { %v514_v51 = vpack.c.bf16 %v496_v50, %v468_v49 }
  0xdc   : > { %516 = vst [vmem:[%s219_s15 + $0x8] sm:$0xff] %v514_v51 }
  0xdd   : > { %998 = shalt.err (!%p995_p0)
}
  0xde   : > { %s1063_s30 = smov 128   ;;  %s1064_s6 = smov 256  }
  0xdf   : > { %s1065_s7 = smov 8  }
  0xe0   : > { %838 = dma.vmem_to_hbm [thread:$0]  (%p1163_p5), %s534_s16, 256, %s536_s21, %s518_s12, %s1063_s30, %s1064_s6, %s1065_s7  }
  0xe1 PF: > { %s550_s17 = sand.u32 1, %s1037_s9   ;;  %p849_p3 = pnand %p647_p11, %p1130_p6 }
  0xe2   : > { %s551_s19 = scalar_lea.sflag [#allocation5], %s550_s17 }
  0xe3   : > { %p850_p7 = pneg %p849_p3 }
  0xe5   : > { %1032 = dma.done.wait (%p850_p7), %s551_s19, 256  }
  0xe6   : > { %1034 = vsyncadd (%p850_p7), %s551_s19, 4294967040  ;;  %s19_s14 = sadd.s32 1, %s1057_s14   ;;  %s1314_s9 = smov %s1041_s10 }
  0xe7   : > { %p16_p9 = scmp.ge.s32.totalorder %s19_s14, 4   ;;  %s1315_s10 = smov %s1045_s11 }
  0xe8   : > { %s1316_s11 = smov %s1172_s8  ;;  %s1317_s12 = smov %s1053_s13 }
  0xe9   : > { %s1318_s13 = smov %s1320_s29  ;;  %18 = sbr.rel (!%p16_p9) target bundleno = 7 (0x7), region = 87 }
  0xee   :  { %557 = vsyncpa [#allocation4], 1 }
  0xef   :  { %559 = vsyncpa [#allocation4 + $0x1], 1 }
  0xf0   :  { %560 = vsyncpa [#allocation7], 1 }
  0xf1   :  { %562 = vsyncpa [#allocation7 + $0x1], 1 }
  0xf2   :  { %563 = vsyncpa [#allocation5], 1 }
  0xf3   :  { %565 = vsyncpa [#allocation5 + $0x1], 1 }

</bundles_post_ra>
